<compile_context>
chip_gen: v5e
topology: v5e:2x2
jax: 0.10.0
libtpu: 0.0.40
codegen_flags: <defaults>
</compile_context>

<pallas_src>
import functools

import jax
import jax.numpy as jnp
from jax.experimental import pallas as pl
from jax.experimental.pallas import tpu as pltpu


LANE = 128
SUBLANE = 8
MAX_TILE = 1024
VMEM_LIMIT = 32 * 1024 * 1024
FUSED_FWD_MAX_NODES = 1024           # whole-forward-in-one-call threshold (padded)
XW_RESIDENT_MAX_BYTES = 8 * 1024 * 1024


def _round_up(x, m):
    return ((x + m - 1) // m) * m


def _choose_tiles(n):
    """Padded node count and square (tm, tk) tile for the tiled aggregation grid.

    Nodes are padded to a multiple of 128 lanes; the tile is the largest multiple
    of 128 (<= MAX_TILE) whose padding waste stays below ~10%.
    """
    n128 = _round_up(max(n, SUBLANE), LANE)
    for t in range(MAX_TILE, 0, -LANE):
        n_pad = _round_up(n128, t)
        if n_pad <= 1.10 * n128 or t == LANE:
            return n_pad, t, t
    return n128, LANE, LANE  # unreachable


# ---------------------------------------------------------------------------
# Pallas kernels
# ---------------------------------------------------------------------------
def _make_fused_forward_kernel(nlayer):
    """Whole forward (all GCN layers + dense head) in one kernel, all in VMEM."""

    def kernel(a_ref, x_ref, *refs):
        o_ref = refs[-1]
        wb = refs[:-1]           # w0, b0, w1, b1, ..., w_dense, b_dense
        a = a_ref[...]
        h = x_ref[...]
        for l in range(nlayer):
            w = wb[2 * l][...]
            b = wb[2 * l + 1][...]
            xw = jnp.dot(h, w, preferred_element_type=jnp.float32)
            h = jnp.maximum(jnp.dot(a, xw, preferred_element_type=jnp.float32) + b, 0.0)
            # TODO(synk): training-mode dropout (random masking) not implemented;
            # eval-mode identity.
        wd = wb[2 * nlayer][...]
        bd = wb[2 * nlayer + 1][...]
        o_ref[...] = jnp.dot(h, wd, preferred_element_type=jnp.float32) + bd

    return kernel


def _xw_kernel(x_ref, w_ref, o_ref):
    # Layer-0 feature transform X @ W, emitted in bf16 for the aggregation.
    o_ref[...] = jnp.dot(
        x_ref[...], w_ref[...], preferred_element_type=jnp.float32
    ).astype(o_ref.dtype)


def _gcn_agg_next_kernel(a_ref, xw_ref, b_ref, wn_ref, o_ref, acc_ref, *, tk,
                         xw_resident):
    # One (row-tile, k-tile) step of  relu(A @ XW + b) @ W_next  (next layer's XW).
    k = pl.program_id(1)

    @pl.when(k == 0)
    def _():
        acc_ref[...] = jnp.zeros_like(acc_ref)

    if xw_resident:
        start = pl.multiple_of(k * tk, tk)
        xw = xw_ref[pl.ds(start, tk), :]
    else:
        xw = xw_ref[...]

    acc_ref[...] += jnp.dot(a_ref[...], xw, preferred_element_type=jnp.float32)

    @pl.when(k == pl.num_programs(1) - 1)
    def _():
        h = jnp.maximum(acc_ref[...] + b_ref[...], 0.0)
        o_ref[...] = jnp.dot(
            h, wn_ref[...], preferred_element_type=jnp.float32
        ).astype(o_ref.dtype)


def _gcn_agg_dense_kernel(a_ref, xw_ref, b_ref, wd_ref, bd_ref, o_ref, acc_ref, *,
                          tk, xw_resident):
    # Last GCN layer with the final nn.Linear fused into the epilogue:
    #   relu(A @ XW + b) @ W_dense + b_dense
    k = pl.program_id(1)

    @pl.when(k == 0)
    def _():
        acc_ref[...] = jnp.zeros_like(acc_ref)

    if xw_resident:
        start = pl.multiple_of(k * tk, tk)
        xw = xw_ref[pl.ds(start, tk), :]
    else:
        xw = xw_ref[...]

    acc_ref[...] += jnp.dot(a_ref[...], xw, preferred_element_type=jnp.float32)

    @pl.when(k == pl.num_programs(1) - 1)
    def _():
        h = jnp.maximum(acc_ref[...] + b_ref[...], 0.0)
        o_ref[...] = (
            jnp.dot(h, wd_ref[...], preferred_element_type=jnp.float32) + bd_ref[...]
        )


# ---------------------------------------------------------------------------
# Pallas wrappers
# ---------------------------------------------------------------------------
def fused_gnn_call(a, x, convs, dense_w, dense_b):
    """Whole forward in a single pallas_call (small graphs, everything in VMEM)."""
    n_pad = a.shape[0]
    no_pad = dense_w.shape[1]
    flat = []
    for w, b in convs:
        flat.extend((w, b))
    flat.extend((dense_w, dense_b))
    return pl.pallas_call(
        _make_fused_forward_kernel(len(convs)),
        out_shape=jax.ShapeDtypeStruct((n_pad, no_pad), jnp.float32),
        compiler_params=pltpu.CompilerParams(vmem_limit_bytes=VMEM_LIMIT),
    )(a, x, *flat)


def xw_matmul(x, w, *, tm):
    """X @ W, row-tiled, bf16 output (lane-dense: feature dims pre-padded to 128)."""
    n_pad, f_in = x.shape
    f_out = w.shape[1]
    cost = pl.CostEstimate(
        flops=2 * n_pad * f_in * f_out,
        transcendentals=0,
        bytes_accessed=4 * n_pad * f_in + 4 * f_in * f_out + 2 * n_pad * f_out,
    )
    return pl.pallas_call(
        _xw_kernel,
        out_shape=jax.ShapeDtypeStruct((n_pad, f_out), jnp.bfloat16),
        grid_spec=pltpu.PrefetchScalarGridSpec(
            num_scalar_prefetch=0,
            grid=(n_pad // tm,),
            in_specs=[
                pl.BlockSpec((tm, f_in), lambda i: (i, 0)),
                pl.BlockSpec((f_in, f_out), lambda i: (0, 0)),  # grid-invariant
            ],
            out_specs=pl.BlockSpec((tm, f_out), lambda i: (i, 0)),
        ),
        compiler_params=pltpu.CompilerParams(
            dimension_semantics=("parallel",),
            vmem_limit_bytes=VMEM_LIMIT,
        ),
        cost_estimate=cost,
    )(x, w)


def _xw_spec(n_pad, f_mid, tk, xw_resident):
    if xw_resident:
        return pl.BlockSpec((n_pad, f_mid), lambda i, k: (0, 0))   # VMEM-resident
    return pl.BlockSpec((tk, f_mid), lambda i, k: (k, 0))


def gcn_agg_next(a, xw, b, w_next, *, tm, tk):
    """relu(A @ XW + b) @ W_next  -> next layer's XW (bf16), tiled (rows x k)."""
    n_pad = a.shape[0]
    f_mid = xw.shape[1]
    f_next = w_next.shape[1]
    xw_resident = n_pad * f_mid * 2 <= XW_RESIDENT_MAX_BYTES
    kernel = functools.partial(_gcn_agg_next_kernel, tk=tk, xw_resident=xw_resident)
    cost = pl.CostEstimate(
        flops=2 * n_pad * n_pad * f_mid + 2 * n_pad * f_mid * f_next,
        transcendentals=0,
        bytes_accessed=(
            2 * n_pad * n_pad + 2 * n_pad * f_mid + 4 * f_mid * f_next
            + 2 * n_pad * f_next
        ),
    )
    return pl.pallas_call(
        kernel,
        out_shape=jax.ShapeDtypeStruct((n_pad, f_next), jnp.bfloat16),
        grid_spec=pltpu.PrefetchScalarGridSpec(
            num_scalar_prefetch=0,
            grid=(n_pad // tm, n_pad // tk),
            in_specs=[
                pl.BlockSpec((tm, tk), lambda i, k: (i, k)),        # A tile (bf16)
                _xw_spec(n_pad, f_mid, tk, xw_resident),            # XW (bf16)
                pl.BlockSpec((1, f_mid), lambda i, k: (0, 0)),      # conv bias
                pl.BlockSpec((f_mid, f_next), lambda i, k: (0, 0)),  # next-layer W
            ],
            out_specs=pl.BlockSpec((tm, f_next), lambda i, k: (i, 0)),
            scratch_shapes=[pltpu.VMEM((tm, f_mid), jnp.float32)],
        ),
        compiler_params=pltpu.CompilerParams(
            dimension_semantics=("parallel", "arbitrary"),
            vmem_limit_bytes=VMEM_LIMIT,
        ),
        cost_estimate=cost,
    )(a, xw, b, w_next)


def gcn_agg_dense(a, xw, b, wd, bd, *, tm, tk):
    """Last GCN layer fused with the final Linear in the epilogue (f32 output)."""
    n_pad = a.shape[0]
    f_hid = xw.shape[1]
    f_out = wd.shape[1]
    xw_resident = n_pad * f_hid * 2 <= XW_RESIDENT_MAX_BYTES
    kernel = functools.partial(_gcn_agg_dense_kernel, tk=tk, xw_resident=xw_resident)
    cost = pl.CostEstimate(
        flops=2 * n_pad * n_pad * f_hid + 2 * n_pad * f_hid * f_out,
        transcendentals=0,
        bytes_accessed=(
            2 * n_pad * n_pad + 2 * n_pad * f_hid + 4 * f_hid * f_out
            + 4 * n_pad * f_out
        ),
    )
    return pl.pallas_call(
        kernel,
        out_shape=jax.ShapeDtypeStruct((n_pad, f_out), jnp.float32),
        grid_spec=pltpu.PrefetchScalarGridSpec(
            num_scalar_prefetch=0,
            grid=(n_pad // tm, n_pad // tk),
            in_specs=[
                pl.BlockSpec((tm, tk), lambda i, k: (i, k)),        # A tile (bf16)
                _xw_spec(n_pad, f_hid, tk, xw_resident),            # XW (bf16)
                pl.BlockSpec((1, f_hid), lambda i, k: (0, 0)),      # conv bias
                pl.BlockSpec((f_hid, f_out), lambda i, k: (0, 0)),  # dense W
                pl.BlockSpec((1, f_out), lambda i, k: (0, 0)),      # dense bias
            ],
            out_specs=pl.BlockSpec((tm, f_out), lambda i, k: (i, 0)),
            scratch_shapes=[pltpu.VMEM((tm, f_hid), jnp.float32)],
        ),
        compiler_params=pltpu.CompilerParams(
            dimension_semantics=("parallel", "arbitrary"),
            vmem_limit_bytes=VMEM_LIMIT,
        ),
        cost_estimate=cost,
    )(a, xw, b, wd, bd)


# ---------------------------------------------------------------------------
# Glue: symmetrically-normalized dense adjacency (scatter-add stays in plain JAX)
# ---------------------------------------------------------------------------
def gcn_norm_dense(edge_index, edge_weight, num_nodes):
    src = edge_index[0]
    dst = edge_index[1]
    a = jnp.zeros((num_nodes, num_nodes), dtype=jnp.float32)
    # message flows src -> dst; aggregation row = dst, column = src
    a = a.at[dst, src].add(edge_weight.astype(jnp.float32))
    # add_remaining_self_loops: only nodes WITHOUT an existing self-loop get weight 1.
    is_loop = (src == dst).astype(jnp.float32)
    has_loop = jnp.zeros((num_nodes,), jnp.float32).at[dst].add(is_loop) > 0
    a = a + jnp.diag(jnp.where(has_loop, 0.0, 1.0))
    deg = jnp.sum(a, axis=1)
    d_inv_sqrt = jnp.where(deg > 0, jax.lax.rsqrt(deg), 0.0)
    return d_inv_sqrt[:, None] * a * d_inv_sqrt[None, :]


# ---------------------------------------------------------------------------
# Model: parameter init (lane-padded to 128) + forward
# ---------------------------------------------------------------------------
def init_gnn_params(key, ninput, noutput, nlayer):
    """Synthetic parameters matching the PyTorch module's shapes, zero-padded to 128 lanes."""
    params = {"convs": [], "ninput": ninput, "noutput": noutput}
    nhidden = 16
    dims = [(ninput, nhidden)]
    for _ in range(nlayer - 1):
        dims.append((nhidden, nhidden * 2))
        nhidden *= 2
    keys = jax.random.split(key, len(dims) + 1)
    for k, (fin, fout) in zip(keys[:-1], dims):
        kw, kb = jax.random.split(k)
        w = jax.random.normal(kw, (fin, fout), dtype=jnp.float32) * 0.1
        b = jax.random.normal(kb, (fout,), dtype=jnp.float32) * 0.1
        fin_p, fout_p = _round_up(fin, LANE), _round_up(fout, LANE)
        w_p = jnp.zeros((fin_p, fout_p), jnp.float32).at[:fin, :fout].set(w)
        b_p = jnp.zeros((1, fout_p), jnp.float32).at[0, :fout].set(b)
        params["convs"].append((w_p, b_p))
    kw, kb = jax.random.split(keys[-1])
    wd = jax.random.normal(kw, (nhidden, noutput), dtype=jnp.float32) * 0.1
    bd = jax.random.normal(kb, (noutput,), dtype=jnp.float32) * 0.1
    nh_p, no_p = _round_up(nhidden, LANE), _round_up(noutput, LANE)
    params["dense_w"] = (
        jnp.zeros((nh_p, no_p), jnp.float32).at[:nhidden, :noutput].set(wd)
    )
    params["dense_b"] = jnp.zeros((1, no_p), jnp.float32).at[0, :noutput].set(bd)
    return params


def gnn_forward(params, x, edge_index, edge_weight):
    n, f_in = x.shape
    f_in_pad = _round_up(f_in, LANE)
    convs = params["convs"]
    wd, bd = params["dense_w"], params["dense_b"]

    # Normalized adjacency: built in plain JAX (scatter).
    a = gcn_norm_dense(edge_index, edge_weight, n)
    n128 = _round_up(max(n, SUBLANE), LANE)

    if n128 <= FUSED_FWD_MAX_NODES:
        # Small-graph path: entire forward in one pallas_call (A kept f32 in VMEM).
        n_pad = n128
        a_p = jnp.pad(a, ((0, n_pad - n), (0, n_pad - n)))
        x_p = jnp.pad(x.astype(jnp.float32), ((0, n_pad - n), (0, f_in_pad - f_in)))
        out = fused_gnn_call(a_p, x_p, convs, wd, bd)
        return out[:n, : params["noutput"]]

    # Large-graph path: tiled aggregation, A streamed in bf16, XW fused per layer.
    n_pad, tm, tk = _choose_tiles(n)
    a_p = jnp.pad(a, ((0, n_pad - n), (0, n_pad - n))).astype(jnp.bfloat16)
    x_p = jnp.pad(x.astype(jnp.float32), ((0, n_pad - n), (0, f_in_pad - f_in)))

    xw = xw_matmul(x_p, convs[0][0], tm=tm)          # layer-0 XW only
    out = None
    for li, (_, b) in enumerate(convs):
        if li < len(convs) - 1:
            w_next = convs[li + 1][0]
            xw = gcn_agg_next(a_p, xw, b, w_next, tm=tm, tk=tk)
        else:
            out = gcn_agg_dense(a_p, xw, b, wd, bd, tm=tm, tk=tk)
        # TODO(synk): training-mode dropout not implemented; eval-mode identity.
    return out[:n, : params["noutput"]]


# ---------------------------------------------------------------------------
# Main
# ---------------------------------------------------------------------------
if __name__ == "__main__":
    key = jax.random.PRNGKey(0)
    k_x, k_e, k_w, k_p = jax.random.split(key, 4)

    # Small graph: exercises the fully-fused single-call path.
    num_nodes = 16
    ninput = 4
    noutput = 3
    nlayer = 2
    num_edges = 32

    x = jax.random.normal(k_x, (num_nodes, ninput), dtype=jnp.float32)
    edge_index = jax.random.randint(k_e, (2, num_edges), 0, num_nodes, dtype=jnp.int32)
    edge_weight = jax.random.uniform(k_w, (num_edges,), dtype=jnp.float32)

    params = init_gnn_params(k_p, ninput, noutput, nlayer)
    fwd = jax.jit(lambda xx, ei, ew: gnn_forward(params, xx, ei, ew))
    out = fwd(x, edge_index, edge_weight)
    jax.block_until_ready(out)
    assert out.shape == (num_nodes, noutput), out.shape

    # Larger graph: exercises the tiled aggregation path (grid > 1 in both axes,
    # XW-in-epilogue fusion across 3 layers, resident-XW slicing).
    n2, e2, nl2 = 1500, 6000, 3
    k_x2, k_e2, k_w2, k_p2 = jax.random.split(jax.random.PRNGKey(1), 4)
    x2 = jax.random.normal(k_x2, (n2, ninput), dtype=jnp.float32)
    ei2 = jax.random.randint(k_e2, (2, e2), 0, n2, dtype=jnp.int32)
    ew2 = jax.random.uniform(k_w2, (e2,), dtype=jnp.float32)
    params2 = init_gnn_params(k_p2, ninput, noutput, nl2)
    fwd2 = jax.jit(lambda xx, ei, ew: gnn_forward(params2, xx, ei, ew))
    out2 = fwd2(x2, ei2, ew2)
    jax.block_until_ready(out2)
    assert out2.shape == (n2, noutput), out2.shape

    print("KERNEL_OK")
</pallas_src>

<mosaic_0001>
module attributes {stable_mosaic.version = 11 : i64} {
  func.func @kernel(%arg0: memref<128x128xf32, #tpu.memory_space<vmem>>, %arg1: memref<128x128xf32, #tpu.memory_space<vmem>>, %arg2: memref<128x128xf32, #tpu.memory_space<vmem>>, %arg3: memref<1x128xf32, #tpu.memory_space<vmem>>, %arg4: memref<128x128xf32, #tpu.memory_space<vmem>>, %arg5: memref<1x128xf32, #tpu.memory_space<vmem>>, %arg6: memref<128x128xf32, #tpu.memory_space<vmem>>, %arg7: memref<1x128xf32, #tpu.memory_space<vmem>>, %arg8: memref<128x128xf32, #tpu.memory_space<vmem>>) attributes {dimension_semantics = [], scalar_prefetch = 0 : i64, scratch_operands = 0 : i64, tpu.core_type = #tpu.core_type<tc>} {
    %c0 = arith.constant 0 : index
    %c0_0 = arith.constant 0 : index
    %0 = vector.load %arg0[%c0, %c0_0] : memref<128x128xf32, #tpu.memory_space<vmem>>, vector<128x128xf32>
    %c0_1 = arith.constant 0 : index
    %c0_2 = arith.constant 0 : index
    %1 = vector.load %arg1[%c0_1, %c0_2] : memref<128x128xf32, #tpu.memory_space<vmem>>, vector<128x128xf32>
    %c0_3 = arith.constant 0 : index
    %c0_4 = arith.constant 0 : index
    %2 = vector.load %arg2[%c0_3, %c0_4] : memref<128x128xf32, #tpu.memory_space<vmem>>, vector<128x128xf32>
    %c0_5 = arith.constant 0 : index
    %c0_6 = arith.constant 0 : index
    %3 = vector.load %arg3[%c0_5, %c0_6] : memref<1x128xf32, #tpu.memory_space<vmem>>, vector<1x128xf32>
    %cst = arith.constant dense<0.000000e+00> : vector<128x128xf32>
    %4 = tpu.matmul %1, %2, %cst {dimension_numbers = #tpu.dot_dimension_numbers<[1], [0], [0], [1], [0, 0, 1, 1], [], []>} : vector<128x128xf32>, vector<128x128xf32>, vector<128x128xf32> -> vector<128x128xf32>
    %cst_7 = arith.constant dense<0.000000e+00> : vector<128x128xf32>
    %5 = tpu.matmul %0, %4, %cst_7 {dimension_numbers = #tpu.dot_dimension_numbers<[1], [0], [0], [1], [0, 0, 1, 1], [], []>} : vector<128x128xf32>, vector<128x128xf32>, vector<128x128xf32> -> vector<128x128xf32>
    %6 = vector.broadcast %3 : vector<1x128xf32> to vector<128x128xf32>
    %7 = arith.addf %5, %6 : vector<128x128xf32>
    %cst_8 = arith.constant 0.000000e+00 : f32
    %8 = vector.broadcast %cst_8 : f32 to vector<128x128xf32>
    %9 = arith.maximumf %7, %8 : vector<128x128xf32>
    %c0_9 = arith.constant 0 : index
    %c0_10 = arith.constant 0 : index
    %10 = vector.load %arg4[%c0_9, %c0_10] : memref<128x128xf32, #tpu.memory_space<vmem>>, vector<128x128xf32>
    %c0_11 = arith.constant 0 : index
    %c0_12 = arith.constant 0 : index
    %11 = vector.load %arg5[%c0_11, %c0_12] : memref<1x128xf32, #tpu.memory_space<vmem>>, vector<1x128xf32>
    %cst_13 = arith.constant dense<0.000000e+00> : vector<128x128xf32>
    %12 = tpu.matmul %9, %10, %cst_13 {dimension_numbers = #tpu.dot_dimension_numbers<[1], [0], [0], [1], [0, 0, 1, 1], [], []>} : vector<128x128xf32>, vector<128x128xf32>, vector<128x128xf32> -> vector<128x128xf32>
    %cst_14 = arith.constant dense<0.000000e+00> : vector<128x128xf32>
    %13 = tpu.matmul %0, %12, %cst_14 {dimension_numbers = #tpu.dot_dimension_numbers<[1], [0], [0], [1], [0, 0, 1, 1], [], []>} : vector<128x128xf32>, vector<128x128xf32>, vector<128x128xf32> -> vector<128x128xf32>
    %14 = vector.broadcast %11 : vector<1x128xf32> to vector<128x128xf32>
    %15 = arith.addf %13, %14 : vector<128x128xf32>
    %cst_15 = arith.constant 0.000000e+00 : f32
    %16 = vector.broadcast %cst_15 : f32 to vector<128x128xf32>
    %17 = arith.maximumf %15, %16 : vector<128x128xf32>
    %c0_16 = arith.constant 0 : index
    %c0_17 = arith.constant 0 : index
    %18 = vector.load %arg6[%c0_16, %c0_17] : memref<128x128xf32, #tpu.memory_space<vmem>>, vector<128x128xf32>
    %c0_18 = arith.constant 0 : index
    %c0_19 = arith.constant 0 : index
    %19 = vector.load %arg7[%c0_18, %c0_19] : memref<1x128xf32, #tpu.memory_space<vmem>>, vector<1x128xf32>
    %cst_20 = arith.constant dense<0.000000e+00> : vector<128x128xf32>
    %20 = tpu.matmul %17, %18, %cst_20 {dimension_numbers = #tpu.dot_dimension_numbers<[1], [0], [0], [1], [0, 0, 1, 1], [], []>} : vector<128x128xf32>, vector<128x128xf32>, vector<128x128xf32> -> vector<128x128xf32>
    %21 = vector.broadcast %19 : vector<1x128xf32> to vector<128x128xf32>
    %22 = arith.addf %20, %21 : vector<128x128xf32>
    %c0_21 = arith.constant 0 : index
    %c0_22 = arith.constant 0 : index
    %23 = vector.load %arg8[%c0_21, %c0_22] : memref<128x128xf32, #tpu.memory_space<vmem>>, vector<128x128xf32>
    tpu.vector_store %arg8[%c0_21, %c0_22], %22 {strides = array<i32>} : memref<128x128xf32, #tpu.memory_space<vmem>>, vector<128x128xf32>,
    return
  }
}

</mosaic_0001>

<bundles_post_ra>
// kernel: _lambda_.1
= control target key start
LH: loop header
LB: loop body
LE: loop exit
PB: predicated region body
PF: predicated region fallthrough
CT: control target
= control target key end

     0   :  { %s973_s2 = inlined_call_operand.vmem [shape: f32[128,128], index: 2, kind: input, shape index: {}]   ;;  %s974_s1 = inlined_call_operand.vmem [shape: f32[128,128], index: 1, kind: input, shape index: {}]   ;;  %s975_s3 = inlined_call_operand.vmem [shape: f32[1,128], index: 3, kind: input, shape index: {}]   ;;  %s976_s0 = inlined_call_operand.vmem [shape: f32[128,128], index: 0, kind: input, shape index: {}]   ;;  %s977_s4 = inlined_call_operand.vmem [shape: f32[128,128], index: 4, kind: input, shape index: {}]   ;;  %s978_s5 = inlined_call_operand.vmem [shape: f32[1,128], index: 5, kind: input, shape index: {}]   ;;  %s979_s6 = inlined_call_operand.vmem [shape: f32[128,128], index: 6, kind: input, shape index: {}]   ;;  %s980_s7 = inlined_call_operand.vmem [shape: f32[1,128], index: 7, kind: input, shape index: {}]   ;;  %s981_s8 = inlined_call_operand.vmem [shape: f32[128,128], index: 8, kind: output, shape index: {}]  }
   0x1   :  { %v76_v0 = vld [vmem:[%s973_s2 + $0x78] sm:$0xff]  ;;  %v75_v1 = vld [vmem:[%s973_s2 + $0x70] sm:$0xff]  ;;  %v74_v2 = vld [vmem:[%s973_s2 + $0x68] sm:$0xff] }
   0x2   :  { %500 = vmatpush.msra.mxu3 %v76_v0  ;;  %499 = vmatpush.msra.mxu2 %v76_v0  ;;  %v73_v3 = vld [vmem:[%s973_s2 + $0x60] sm:$0xff]  ;;  %v72_v4 = vld [vmem:[%s973_s2 + $0x58] sm:$0xff]  ;;  %v71_v5 = vld [vmem:[%s973_s2 + $0x50] sm:$0xff] }
   0x3   :  { %498 = vmatpush.msra.mxu1 %v76_v0  ;;  %78 = vmatpush.msra.mxu0 %v76_v0  ;;  %v70_v6 = vld [vmem:[%s973_s2 + $0x48] sm:$0xff]  ;;  %v69_v7 = vld [vmem:[%s973_s2 + $0x40] sm:$0xff]  ;;  %v68_v8 = vld [vmem:[%s973_s2 + $0x38] sm:$0xff] }
   0x4   :  { %503 = vmatpush.msra.mxu3 %v75_v1  ;;  %502 = vmatpush.msra.mxu2 %v75_v1  ;;  %v67_v9 = vld [vmem:[%s973_s2 + $0x30] sm:$0xff]  ;;  %v66_v10 = vld [vmem:[%s973_s2 + $0x28] sm:$0xff]  ;;  %v65_v11 = vld [vmem:[%s973_s2 + $0x20] sm:$0xff] }
   0x5   :  { %501 = vmatpush.msra.mxu1 %v75_v1  ;;  %79 = vmatpush.msra.mxu0 %v75_v1  ;;  %v64_v12 = vld [vmem:[%s973_s2 + $0x18] sm:$0xff]  ;;  %v63_v13 = vld [vmem:[%s973_s2 + $0x10] sm:$0xff]  ;;  %v62_v14 = vld [vmem:[%s973_s2 + $0x8] sm:$0xff] }
   0x6   :  { %506 = vmatpush.msra.mxu3 %v74_v2  ;;  %505 = vmatpush.msra.mxu2 %v74_v2  ;;  %v61_v15 = vld [vmem:[%s973_s2] sm:$0xff]  ;;  %v58_v20 = vld [vmem:[%s974_s1 + $0x68] sm:$0xff]  ;;  %v59_v24 = vld [vmem:[%s974_s1 + $0x70] sm:$0xff] }
   0x7   :  { %504 = vmatpush.msra.mxu1 %v74_v2  ;;  %80 = vmatpush.msra.mxu0 %v74_v2  ;;  %v57_v16 = vld [vmem:[%s974_s1 + $0x60] sm:$0xff]  ;;  %v54_v21 = vld [vmem:[%s974_s1 + $0x48] sm:$0xff]  ;;  %v55_v25 = vld [vmem:[%s974_s1 + $0x50] sm:$0xff] }
   0x8   :  { %509 = vmatpush.msra.mxu3 %v73_v3  ;;  %508 = vmatpush.msra.mxu2 %v73_v3  ;;  %v53_v17 = vld [vmem:[%s974_s1 + $0x40] sm:$0xff]  ;;  %v50_v22 = vld [vmem:[%s974_s1 + $0x28] sm:$0xff]  ;;  %v51_v26 = vld [vmem:[%s974_s1 + $0x30] sm:$0xff] }
   0x9   :  { %507 = vmatpush.msra.mxu1 %v73_v3  ;;  %81 = vmatpush.msra.mxu0 %v73_v3  ;;  %v49_v18 = vld [vmem:[%s974_s1 + $0x20] sm:$0xff]  ;;  %v46_v23 = vld [vmem:[%s974_s1 + $0x8] sm:$0xff]  ;;  %v47_v27 = vld [vmem:[%s974_s1 + $0x10] sm:$0xff] }
   0xa   :  { %512 = vmatpush.msra.mxu3 %v72_v4  ;;  %511 = vmatpush.msra.mxu2 %v72_v4  ;;  %v45_v19 = vld [vmem:[%s974_s1] sm:$0xff]  ;;  %v60_v28 = vld [vmem:[%s974_s1 + $0x78] sm:$0xff]  ;;  %v699_v49 = vld [vmem:[%s976_s0 + $0x8] sm:$0xff] }
   0xb   :  { %510 = vmatpush.msra.mxu1 %v72_v4  ;;  %82 = vmatpush.msra.mxu0 %v72_v4  ;;  %v56_v29 = vld [vmem:[%s974_s1 + $0x58] sm:$0xff]  ;;  %v693_v48 = vld [vmem:[%s976_s0] sm:$0xff]  ;;  %v705_v50 = vld [vmem:[%s976_s0 + $0x10] sm:$0xff] }
   0xc   :  { %515 = vmatpush.msra.mxu3 %v71_v5  ;;  %514 = vmatpush.msra.mxu2 %v71_v5  ;;  %v52_v30 = vld [vmem:[%s974_s1 + $0x38] sm:$0xff]  ;;  %v717_v52 = vld [vmem:[%s976_s0 + $0x20] sm:$0xff]  ;;  %v723_v53 = vld [vmem:[%s976_s0 + $0x28] sm:$0xff] }
   0xd   :  { %513 = vmatpush.msra.mxu1 %v71_v5  ;;  %83 = vmatpush.msra.mxu0 %v71_v5  ;;  %v48_v31 = vld [vmem:[%s974_s1 + $0x18] sm:$0xff]  ;;  %v729_v54 = vld [vmem:[%s976_s0 + $0x30] sm:$0xff]  ;;  %v741_v56 = vld [vmem:[%s976_s0 + $0x40] sm:$0xff] }
   0xe   :  { %518 = vmatpush.msra.mxu3 %v70_v6  ;;  %517 = vmatpush.msra.mxu2 %v70_v6  ;;  %v711_v51 = vld [vmem:[%s976_s0 + $0x18] sm:$0xff]  ;;  %v241_v58 = vld [vmem:[%s977_s4 + $0x70] sm:$0xff]  ;;  %v240_v59 = vld [vmem:[%s977_s4 + $0x68] sm:$0xff] }
   0xf   :  { %516 = vmatpush.msra.mxu1 %v70_v6  ;;  %84 = vmatpush.msra.mxu0 %v70_v6  ;;  %v735_v55 = vld [vmem:[%s976_s0 + $0x38] sm:$0xff]  ;;  %v756_v60 = vld [vmem:[%s976_s0 + $0x48] sm:$0xff]  ;;  %v239_v61 = vld [vmem:[%s977_s4 + $0x60] sm:$0xff] }
  0x10   :  { %521 = vmatpush.msra.mxu3 %v69_v7  ;;  %520 = vmatpush.msra.mxu2 %v69_v7  ;;  %v242_v57 = vld [vmem:[%s977_s4 + $0x78] sm:$0xff]  ;;  %v237_v63 = vld [vmem:[%s977_s4 + $0x50] sm:$0xff]  ;;  %v236_v0 = vld [vmem:[%s977_s4 + $0x48] sm:$0xff] }
  0x11   :  { %519 = vmatpush.msra.mxu1 %v69_v7  ;;  %85 = vmatpush.msra.mxu0 %v69_v7  ;;  %v238_v62 = vld [vmem:[%s977_s4 + $0x58] sm:$0xff]  ;;  %v774_v1 = vld [vmem:[%s976_s0 + $0x50] sm:$0xff]  ;;  %v235_v2 = vld [vmem:[%s977_s4 + $0x40] sm:$0xff] }
  0x12   :  { %524 = vmatpush.msra.mxu3 %v68_v8  ;;  %523 = vmatpush.msra.mxu2 %v68_v8  ;;  %v234_v3 = vld [vmem:[%s977_s4 + $0x38] sm:$0xff]  ;;  %v233_v4 = vld [vmem:[%s977_s4 + $0x30] sm:$0xff]  ;;  %v232_v5 = vld [vmem:[%s977_s4 + $0x28] sm:$0xff] }
  0x13   :  { %522 = vmatpush.msra.mxu1 %v68_v8  ;;  %86 = vmatpush.msra.mxu0 %v68_v8  ;;  %v792_v6 = vld [vmem:[%s976_s0 + $0x58] sm:$0xff]  ;;  %v231_v7 = vld [vmem:[%s977_s4 + $0x20] sm:$0xff] }
  0x14   :  { %527 = vmatpush.msra.mxu3 %v67_v9  ;;  %526 = vmatpush.msra.mxu2 %v67_v9  ;;  %v230_v8 = vld [vmem:[%s977_s4 + $0x18] sm:$0xff] }
  0x15   :  { %525 = vmatpush.msra.mxu1 %v67_v9  ;;  %87 = vmatpush.msra.mxu0 %v67_v9  ;;  %v229_v9 = vld [vmem:[%s977_s4 + $0x10] sm:$0xff] }
  0x16   :  { %530 = vmatpush.msra.mxu3 %v66_v10  ;;  %529 = vmatpush.msra.mxu2 %v66_v10 }
  0x17   :  { %528 = vmatpush.msra.mxu1 %v66_v10  ;;  %88 = vmatpush.msra.mxu0 %v66_v10  ;;  %v807_v10 = vld [vmem:[%s976_s0 + $0x60] sm:$0xff] }
  0x18   :  { %533 = vmatpush.msra.mxu3 %v65_v11  ;;  %532 = vmatpush.msra.mxu2 %v65_v11 }
  0x19   :  { %531 = vmatpush.msra.mxu1 %v65_v11  ;;  %89 = vmatpush.msra.mxu0 %v65_v11  ;;  %v228_v11 = vld [vmem:[%s977_s4 + $0x8] sm:$0xff] }
  0x1a   :  { %536 = vmatpush.msra.mxu3 %v64_v12  ;;  %535 = vmatpush.msra.mxu2 %v64_v12 }
  0x1b   :  { %534 = vmatpush.msra.mxu1 %v64_v12  ;;  %90 = vmatpush.msra.mxu0 %v64_v12  ;;  %v227_v12 = vld [vmem:[%s977_s4] sm:$0xff] }
  0x1c   :  { %539 = vmatpush.msra.mxu3 %v63_v13  ;;  %538 = vmatpush.msra.mxu2 %v63_v13 }
  0x1d   :  { %537 = vmatpush.msra.mxu1 %v63_v13  ;;  %91 = vmatpush.msra.mxu0 %v63_v13  ;;  %v819_v13 = vld [vmem:[%s976_s0 + $0x68] sm:$0xff] }
  0x1e   :  { %542 = vmatpush.msra.mxu3 %v62_v14  ;;  %541 = vmatpush.msra.mxu2 %v62_v14 }
  0x1f   :  { %540 = vmatpush.msra.mxu1 %v62_v14  ;;  %92 = vmatpush.msra.mxu0 %v62_v14  ;;  %v825_v14 = vld [vmem:[%s976_s0 + $0x70] sm:$0xff] }
  0x20   :  { %545 = vmatpush.msra.mxu3 %v61_v15  ;;  %544 = vmatpush.msra.mxu2 %v61_v15 }
  0x21   :  { %130 = vmatmul.f32.vlgmr.msra.gmra.mxu3 %v57_v16  ;;  %118 = vmatmul.f32.vlgmr.msra.gmra.mxu2 %v53_v17  ;;  %v546_v16 = vld [vmem:[%s975_s3] ss:$0 sm:$0xff] }
  0x22   :  { %543 = vmatpush.msra.mxu1 %v61_v15  ;;  %93 = vmatpush.msra.mxu0 %v61_v15  ;;  %v831_v15 = vld [vmem:[%s976_s0 + $0x78] sm:$0xff] }
  0x23   :  { %106 = vmatmul.f32.vlgmr.msra.gmra.mxu1 %v49_v18  ;;  %94 = vmatmul.f32.vlgmr.msra.gmra.mxu0 %v45_v19 }
  0x24   :  { %244 = vmatpush.msrb.mxu2 %v242_v57 }
  0x26   :  { %245 = vmatpush.msrb.mxu2 %v241_v58 }
  0x28   :  { %246 = vmatpush.msrb.mxu2 %v240_v59 }
  0x29   :  { %133 = vmatmul.f32.gmra.mxu3 %v58_v20  ;;  %121 = vmatmul.f32.gmra.mxu2 %v54_v21 }
  0x2a   :  { %247 = vmatpush.msrb.mxu2 %v239_v61 }
  0x2b   :  { %109 = vmatmul.f32.gmra.mxu1 %v50_v22  ;;  %97 = vmatmul.f32.gmra.mxu0 %v46_v23 }
  0x2c   :  { %248 = vmatpush.msrb.mxu2 %v238_v62 }
  0x2e   :  { %249 = vmatpush.msrb.mxu2 %v237_v63 }
  0x30   :  { %250 = vmatpush.msrb.mxu2 %v236_v0 }
  0x31   :  { %136 = vmatmul.f32.gmra.mxu3 %v59_v24  ;;  %124 = vmatmul.f32.gmra.mxu2 %v55_v25 }
  0x32   :  { %251 = vmatpush.msrb.mxu2 %v235_v2 }
  0x33   :  { %112 = vmatmul.f32.gmra.mxu1 %v51_v26  ;;  %100 = vmatmul.f32.gmra.mxu0 %v47_v27 }
  0x34   :  { %252 = vmatpush.msrb.mxu2 %v234_v3 }
  0x36   :  { %253 = vmatpush.msrb.mxu2 %v233_v4 }
  0x38   :  { %254 = vmatpush.msrb.mxu2 %v232_v5 }
  0x39   :  { %139 = vmatmul.f32.gmra.mxu3 %v60_v28  ;;  %127 = vmatmul.f32.gmra.mxu2 %v56_v29 }
  0x3a   :  { %255 = vmatpush.msrb.mxu2 %v231_v7 }
  0x3b   :  { %115 = vmatmul.f32.gmra.mxu1 %v52_v30  ;;  %103 = vmatmul.f32.gmra.mxu0 %v48_v31 }
  0x3c   :  { %256 = vmatpush.msrb.mxu2 %v230_v8 }
  0x3e   :  { %257 = vmatpush.msrb.mxu2 %v229_v9 }
  0x40   :  { %258 = vmatpush.msrb.mxu2 %v228_v11 }
  0x42   :  { %259 = vmatpush.msrb.mxu2 %v227_v12 }
  0xa0   :  { %v107_v35 = vpop.f32.mrf.mxu1  ;;  %v95_v38 = vpop.f32.mrf.mxu0 }
  0xa4   :  { %v131_v32 = vpop.f32.mrf.mxu3  ;;  %v119_v33 = vpop.f32.mrf.mxu2 }
  0xa8   :  { %v110_v39 = vpop.f32.mrf.mxu1  ;;  %v98_v42 = vpop.f32.mrf.mxu0 }
  0xac   :  { %v134_v34 = vpop.f32.mrf.mxu3  ;;  %v122_v36 = vpop.f32.mrf.mxu2 }
  0xb0   :  { %v113_v43 = vpop.f32.mrf.mxu1  ;;  %v101_v45 = vpop.f32.mrf.mxu0 }
  0xb4   :  { %v137_v37 = vpop.f32.mrf.mxu3  ;;  %v125_v40 = vpop.f32.mrf.mxu2 }
  0xb8   :  { %v116_v46 = vpop.f32.mrf.mxu1  ;;  %v104_v47 = vpop.f32.mrf.mxu0 }
  0xbc   :  { %v140_v41 = vpop.f32.mrf.mxu3  ;;  %v128_v44 = vpop.f32.mrf.mxu2 }
  0xbd   :  { %146 = vmatpush.msrb.mxu1 %v140_v41 }
  0xbf   :  { %147 = vmatpush.msrb.mxu1 %v137_v37 }
  0xc1   :  { %148 = vmatpush.msrb.mxu1 %v134_v34 }
  0xc3   :  { %149 = vmatpush.msrb.mxu1 %v131_v32 }
  0xc5   :  { %150 = vmatpush.msrb.mxu1 %v128_v44 }
  0xc7   :  { %151 = vmatpush.msrb.mxu1 %v125_v40 }
  0xc9   :  { %152 = vmatpush.msrb.mxu1 %v122_v36 }
  0xcb   :  { %153 = vmatpush.msrb.mxu1 %v119_v33 }
  0xcd   :  { %154 = vmatpush.msrb.mxu1 %v116_v46 }
  0xcf   :  { %155 = vmatpush.msrb.mxu1 %v113_v43 }
  0xd1   :  { %156 = vmatpush.msrb.mxu1 %v110_v39 }
  0xd3   :  { %157 = vmatpush.msrb.mxu1 %v107_v35 }
  0xd5   :  { %158 = vmatpush.msrb.mxu1 %v104_v47 }
  0xd7   :  { %159 = vmatpush.msrb.mxu1 %v101_v45 }
  0xd9   :  { %160 = vmatpush.msrb.mxu1 %v98_v42 }
  0xdb   :  { %161 = vmatpush.msrb.mxu1 %v95_v38 }
  0xdc   :  { %162 = vmatmul.f32.vlgmr.msrb.gmra.mxu1 %v693_v48 }
  0xe4   :  { %165 = vmatmul.f32.gmra.mxu1 %v699_v49 }
  0xec   :  { %168 = vmatmul.f32.gmra.mxu1 %v705_v50 }
  0xf4   :  { %171 = vmatmul.f32.gmra.mxu1 %v711_v51 }
  0xfc   :  { %174 = vmatmul.f32.gmra.mxu1 %v717_v52 }
 0x104   :  { %177 = vmatmul.f32.gmra.mxu1 %v723_v53 }
 0x10c   :  { %180 = vmatmul.f32.gmra.mxu1 %v729_v54 }
 0x114   :  { %183 = vmatmul.f32.gmra.mxu1 %v735_v55 }
 0x11c   :  { %186 = vmatmul.f32.gmra.mxu1 %v741_v56 }
 0x124   :  { %189 = vmatmul.f32.gmra.mxu1 %v756_v60 }
 0x12c   :  { %192 = vmatmul.f32.gmra.mxu1 %v774_v1 }
 0x134   :  { %195 = vmatmul.f32.gmra.mxu1 %v792_v6 }
 0x13c   :  { %198 = vmatmul.f32.gmra.mxu1 %v807_v10 }
 0x144   :  { %201 = vmatmul.f32.gmra.mxu1 %v819_v13 }
 0x14c   :  { %204 = vmatmul.f32.gmra.mxu1 %v825_v14 }
 0x154   :  { %207 = vmatmul.f32.gmra.mxu1 %v831_v15 }
 0x159   :  { %v163_v17 = vpop.f32.mrf.mxu1 }
 0x15a   :  { %v164_v18 = vadd.f32 %v546_v16, %v163_v17 }
 0x15c   :  { %v211_v19 = vmax.f32 %v164_v18, 0.0 }
 0x15e   :  { %260 = vmatmul.f32.vlgmr.msrb.gmra.mxu2 %v211_v19 }
 0x161   :  { %v166_v20 = vpop.f32.mrf.mxu1 }
 0x162   :  { %v167_v21 = vadd.f32 %v546_v16, %v166_v20 }
 0x164   :  { %v212_v22 = vmax.f32 %v167_v21, 0.0 }
 0x166   :  { %263 = vmatmul.f32.gmra.mxu2 %v212_v22 }
 0x169   :  { %v169_v23 = vpop.f32.mrf.mxu1 }
 0x16a   :  { %v170_v24 = vadd.f32 %v546_v16, %v169_v23 }
 0x16c   :  { %v213_v25 = vmax.f32 %v170_v24, 0.0 }
 0x16e   :  { %266 = vmatmul.f32.gmra.mxu2 %v213_v25 }
 0x171   :  { %v172_v26 = vpop.f32.mrf.mxu1 }
 0x172   :  { %v173_v27 = vadd.f32 %v546_v16, %v172_v26 }
 0x174   :  { %v214_v28 = vmax.f32 %v173_v27, 0.0 }
 0x176   :  { %269 = vmatmul.f32.gmra.mxu2 %v214_v28 }
 0x179   :  { %v175_v29 = vpop.f32.mrf.mxu1 }
 0x17a   :  { %v176_v30 = vadd.f32 %v546_v16, %v175_v29 }
 0x17c   :  { %v215_v31 = vmax.f32 %v176_v30, 0.0 }
 0x17e   :  { %272 = vmatmul.f32.gmra.mxu2 %v215_v31 }
 0x181   :  { %v178_v32 = vpop.f32.mrf.mxu1 }
 0x182   :  { %v179_v33 = vadd.f32 %v546_v16, %v178_v32 }
 0x184   :  { %v216_v34 = vmax.f32 %v179_v33, 0.0 }
 0x186   :  { %275 = vmatmul.f32.gmra.mxu2 %v216_v34  ;;  %v395_v34 = vld [vmem:[%s979_s6 + $0x10] sm:$0xff] }
 0x189   :  { %v181_v35 = vpop.f32.mrf.mxu1 }
 0x18a   :  { %v182_v36 = vadd.f32 %v546_v16, %v181_v35  ;;  %v394_v35 = vld [vmem:[%s979_s6 + $0x8] sm:$0xff] }
 0x18c   :  { %v217_v37 = vmax.f32 %v182_v36, 0.0  ;;  %v393_v36 = vld [vmem:[%s979_s6] sm:$0xff] }
 0x18e   :  { %278 = vmatmul.f32.gmra.mxu2 %v217_v37 }
 0x191   :  { %v184_v38 = vpop.f32.mrf.mxu1 }
 0x192   :  { %v185_v39 = vadd.f32 %v546_v16, %v184_v38 }
 0x194   :  { %v218_v40 = vmax.f32 %v185_v39, 0.0 }
 0x196   :  { %281 = vmatmul.f32.gmra.mxu2 %v218_v40 }
 0x199   :  { %v187_v41 = vpop.f32.mrf.mxu1 }
 0x19a   :  { %v188_v42 = vadd.f32 %v546_v16, %v187_v41 }
 0x19c   :  { %v219_v43 = vmax.f32 %v188_v42, 0.0 }
 0x19e   :  { %284 = vmatmul.f32.gmra.mxu2 %v219_v43 }
 0x1a1   :  { %v190_v44 = vpop.f32.mrf.mxu1 }
 0x1a2   :  { %v191_v45 = vadd.f32 %v546_v16, %v190_v44 }
 0x1a4   :  { %v220_v46 = vmax.f32 %v191_v45, 0.0 }
 0x1a6   :  { %287 = vmatmul.f32.gmra.mxu2 %v220_v46 }
 0x1a9   :  { %v193_v47 = vpop.f32.mrf.mxu1 }
 0x1aa   :  { %v194_v57 = vadd.f32 %v546_v16, %v193_v47 }
 0x1ac   :  { %v221_v58 = vmax.f32 %v194_v57, 0.0 }
 0x1ae   :  { %290 = vmatmul.f32.gmra.mxu2 %v221_v58 }
 0x1b1   :  { %v196_v59 = vpop.f32.mrf.mxu1 }
 0x1b2   :  { %v197_v61 = vadd.f32 %v546_v16, %v196_v59 }
 0x1b4   :  { %v222_v62 = vmax.f32 %v197_v61, 0.0 }
 0x1b6   :  { %293 = vmatmul.f32.gmra.mxu2 %v222_v62 }
 0x1b9   :  { %v199_v63 = vpop.f32.mrf.mxu1 }
 0x1ba   :  { %v200_v0 = vadd.f32 %v546_v16, %v199_v63 }
 0x1bc   :  { %v223_v2 = vmax.f32 %v200_v0, 0.0 }
 0x1be   :  { %296 = vmatmul.f32.gmra.mxu2 %v223_v2 }
 0x1c1   :  { %v202_v3 = vpop.f32.mrf.mxu1 }
 0x1c2   :  { %v203_v4 = vadd.f32 %v546_v16, %v202_v3 }
 0x1c4   :  { %v224_v5 = vmax.f32 %v203_v4, 0.0 }
 0x1c6   :  { %299 = vmatmul.f32.gmra.mxu2 %v224_v5 }
 0x1c9   :  { %v205_v7 = vpop.f32.mrf.mxu1 }
 0x1ca   :  { %v206_v8 = vadd.f32 %v546_v16, %v205_v7 }
 0x1cc   :  { %v225_v9 = vmax.f32 %v206_v8, 0.0 }
 0x1ce   :  { %302 = vmatmul.f32.gmra.mxu2 %v225_v9 }
 0x1d1   :  { %v208_v11 = vpop.f32.mrf.mxu1 }
 0x1d2   :  { %v209_v12 = vadd.f32 %v546_v16, %v208_v11  ;;  %v397_v16 = vld [vmem:[%s979_s6 + $0x20] sm:$0xff] }
 0x1d4   :  { %v226_v17 = vmax.f32 %v209_v12, 0.0 }
 0x1d6   :  { %305 = vmatmul.f32.gmra.mxu2 %v226_v17 }
 0x1e1   :  { %v261_v18 = vpop.f32.mrf.mxu2 }
 0x1e9   :  { %v264_v19 = vpop.f32.mrf.mxu2 }
 0x1f1   :  { %v267_v20 = vpop.f32.mrf.mxu2 }
 0x1f9   :  { %v270_v21 = vpop.f32.mrf.mxu2 }
 0x201   :  { %v273_v22 = vpop.f32.mrf.mxu2 }
 0x209   :  { %v276_v23 = vpop.f32.mrf.mxu2 }
 0x211   :  { %v279_v24 = vpop.f32.mrf.mxu2 }
 0x219   :  { %v282_v25 = vpop.f32.mrf.mxu2 }
 0x221   :  { %v285_v26 = vpop.f32.mrf.mxu2 }
 0x229   :  { %v288_v27 = vpop.f32.mrf.mxu2 }
 0x231   :  { %v291_v28 = vpop.f32.mrf.mxu2 }
 0x239   :  { %v294_v29 = vpop.f32.mrf.mxu2 }
 0x241   :  { %v297_v30 = vpop.f32.mrf.mxu2 }
 0x249   :  { %v300_v31 = vpop.f32.mrf.mxu2 }
 0x251   :  { %v303_v32 = vpop.f32.mrf.mxu2 }
 0x259   :  { %v306_v33 = vpop.f32.mrf.mxu2 }
 0x25a   :  { %312 = vmatpush.msrb.mxu3 %v306_v33 }
 0x25c   :  { %313 = vmatpush.msrb.mxu3 %v303_v32 }
 0x25e   :  { %314 = vmatpush.msrb.mxu3 %v300_v31 }
 0x260   :  { %315 = vmatpush.msrb.mxu3 %v297_v30 }
 0x262   :  { %316 = vmatpush.msrb.mxu3 %v294_v29 }
 0x264   :  { %317 = vmatpush.msrb.mxu3 %v291_v28 }
 0x266   :  { %318 = vmatpush.msrb.mxu3 %v288_v27 }
 0x268   :  { %319 = vmatpush.msrb.mxu3 %v285_v26 }
 0x26a   :  { %320 = vmatpush.msrb.mxu3 %v282_v25 }
 0x26c   :  { %321 = vmatpush.msrb.mxu3 %v279_v24 }
 0x26e   :  { %322 = vmatpush.msrb.mxu3 %v276_v23 }
 0x270   :  { %323 = vmatpush.msrb.mxu3 %v273_v22 }
 0x272   :  { %324 = vmatpush.msrb.mxu3 %v270_v21 }
 0x274   :  { %325 = vmatpush.msrb.mxu3 %v267_v20 }
 0x276   :  { %326 = vmatpush.msrb.mxu3 %v264_v19 }
 0x278   :  { %327 = vmatpush.msrb.mxu3 %v261_v18 }
 0x279   :  { %328 = vmatmul.f32.vlgmr.msrb.gmra.mxu3 %v693_v48  ;;  %v408_v48 = vld [vmem:[%s979_s6 + $0x78] sm:$0xff] }
 0x27a   :  { %413 = vmatpush.msrb.mxu0 %v408_v48 }
 0x281   :  { %331 = vmatmul.f32.gmra.mxu3 %v699_v49  ;;  %v407_v49 = vld [vmem:[%s979_s6 + $0x70] sm:$0xff] }
 0x282   :  { %414 = vmatpush.msrb.mxu0 %v407_v49  ;;  %v548_v49 = vld [vmem:[%s980_s7] ss:$0 sm:$0xff] }
 0x289   :  { %334 = vmatmul.f32.gmra.mxu3 %v705_v50  ;;  %v406_v50 = vld [vmem:[%s979_s6 + $0x68] sm:$0xff] }
 0x28a   :  { %415 = vmatpush.msrb.mxu0 %v406_v50 }
 0x291   :  { %337 = vmatmul.f32.gmra.mxu3 %v711_v51  ;;  %v405_v51 = vld [vmem:[%s979_s6 + $0x60] sm:$0xff] }
 0x292   :  { %416 = vmatpush.msrb.mxu0 %v405_v51 }
 0x299   :  { %340 = vmatmul.f32.gmra.mxu3 %v717_v52  ;;  %v404_v52 = vld [vmem:[%s979_s6 + $0x58] sm:$0xff] }
 0x29a   :  { %417 = vmatpush.msrb.mxu0 %v404_v52 }
 0x2a1   :  { %343 = vmatmul.f32.gmra.mxu3 %v723_v53  ;;  %v403_v53 = vld [vmem:[%s979_s6 + $0x50] sm:$0xff] }
 0x2a2   :  { %418 = vmatpush.msrb.mxu0 %v403_v53 }
 0x2a9   :  { %346 = vmatmul.f32.gmra.mxu3 %v729_v54  ;;  %v402_v54 = vld [vmem:[%s979_s6 + $0x48] sm:$0xff] }
 0x2aa   :  { %419 = vmatpush.msrb.mxu0 %v402_v54 }
 0x2b1   :  { %349 = vmatmul.f32.gmra.mxu3 %v735_v55  ;;  %v401_v55 = vld [vmem:[%s979_s6 + $0x40] sm:$0xff] }
 0x2b2   :  { %420 = vmatpush.msrb.mxu0 %v401_v55 }
 0x2b9   :  { %352 = vmatmul.f32.gmra.mxu3 %v741_v56  ;;  %v400_v56 = vld [vmem:[%s979_s6 + $0x38] sm:$0xff] }
 0x2ba   :  { %421 = vmatpush.msrb.mxu0 %v400_v56 }
 0x2c1   :  { %355 = vmatmul.f32.gmra.mxu3 %v756_v60  ;;  %v399_v60 = vld [vmem:[%s979_s6 + $0x30] sm:$0xff] }
 0x2c2   :  { %422 = vmatpush.msrb.mxu0 %v399_v60 }
 0x2c9   :  { %358 = vmatmul.f32.gmra.mxu3 %v774_v1  ;;  %v398_v1 = vld [vmem:[%s979_s6 + $0x28] sm:$0xff] }
 0x2ca   :  { %423 = vmatpush.msrb.mxu0 %v398_v1 }
 0x2cc   :  { %424 = vmatpush.msrb.mxu0 %v397_v16 }
 0x2d1   :  { %361 = vmatmul.f32.gmra.mxu3 %v792_v6  ;;  %v396_v6 = vld [vmem:[%s979_s6 + $0x18] sm:$0xff] }
 0x2d2   :  { %425 = vmatpush.msrb.mxu0 %v396_v6 }
 0x2d4   :  { %426 = vmatpush.msrb.mxu0 %v395_v34 }
 0x2d6   :  { %427 = vmatpush.msrb.mxu0 %v394_v35 }
 0x2d8   :  { %428 = vmatpush.msrb.mxu0 %v393_v36 }
 0x2d9   :  { %364 = vmatmul.f32.gmra.mxu3 %v807_v10  ;;  %v904_v10 = vld [vmem:[%s978_s5] ss:$0 sm:$0xff] }
 0x2e1   :  { %367 = vmatmul.f32.gmra.mxu3 %v819_v13 }
 0x2e9   :  { %370 = vmatmul.f32.gmra.mxu3 %v825_v14 }
 0x2f1   :  { %373 = vmatmul.f32.gmra.mxu3 %v831_v15 }
 0x2fc   :  { %v329_v37 = vpop.f32.mrf.mxu3 }
 0x2fd   :  { %v330_v38 = vadd.f32 %v904_v10, %v329_v37 }
 0x2ff   :  { %v377_v39 = vmax.f32 %v330_v38, 0.0 }
 0x301   :  { %429 = vmatmul.f32.vlgmr.msrb.gmra.mxu0 %v377_v39 }
 0x304   :  { %v332_v40 = vpop.f32.mrf.mxu3 }
 0x305   :  { %v333_v41 = vadd.f32 %v904_v10, %v332_v40 }
 0x307   :  { %v378_v42 = vmax.f32 %v333_v41, 0.0 }
 0x309   :  { %432 = vmatmul.f32.gmra.mxu0 %v378_v42 }
 0x30c   :  { %v335_v13 = vpop.f32.mrf.mxu3 }
 0x30d   :  { %v336_v14 = vadd.f32 %v904_v10, %v335_v13 }
 0x30f   :  { %v379_v43 = vmax.f32 %v336_v14, 0.0 }
 0x311   :  { %435 = vmatmul.f32.gmra.mxu0 %v379_v43 }
 0x314   :  { %v338_v15 = vpop.f32.mrf.mxu3 }
 0x315   :  { %v339_v44 = vadd.f32 %v904_v10, %v338_v15 }
 0x317   :  { %v380_v45 = vmax.f32 %v339_v44, 0.0 }
 0x319   :  { %438 = vmatmul.f32.gmra.mxu0 %v380_v45 }
 0x31c   :  { %v341_v46 = vpop.f32.mrf.mxu3 }
 0x31d   :  { %v342_v47 = vadd.f32 %v904_v10, %v341_v46 }
 0x31f   :  { %v381_v57 = vmax.f32 %v342_v47, 0.0 }
 0x321   :  { %441 = vmatmul.f32.gmra.mxu0 %v381_v57 }
 0x324   :  { %v344_v58 = vpop.f32.mrf.mxu3 }
 0x325   :  { %v345_v59 = vadd.f32 %v904_v10, %v344_v58 }
 0x327   :  { %v382_v61 = vmax.f32 %v345_v59, 0.0 }
 0x329   :  { %444 = vmatmul.f32.gmra.mxu0 %v382_v61 }
 0x32c   :  { %v347_v62 = vpop.f32.mrf.mxu3 }
 0x32d   :  { %v348_v63 = vadd.f32 %v904_v10, %v347_v62 }
 0x32f   :  { %v383_v0 = vmax.f32 %v348_v63, 0.0 }
 0x331   :  { %447 = vmatmul.f32.gmra.mxu0 %v383_v0 }
 0x334   :  { %v350_v2 = vpop.f32.mrf.mxu3 }
 0x335   :  { %v351_v3 = vadd.f32 %v904_v10, %v350_v2 }
 0x337   :  { %v384_v4 = vmax.f32 %v351_v3, 0.0 }
 0x339   :  { %450 = vmatmul.f32.gmra.mxu0 %v384_v4 }
 0x33c   :  { %v353_v5 = vpop.f32.mrf.mxu3 }
 0x33d   :  { %v354_v7 = vadd.f32 %v904_v10, %v353_v5 }
 0x33f   :  { %v385_v8 = vmax.f32 %v354_v7, 0.0 }
 0x341   :  { %453 = vmatmul.f32.gmra.mxu0 %v385_v8 }
 0x344   :  { %v356_v9 = vpop.f32.mrf.mxu3 }
 0x345   :  { %v357_v11 = vadd.f32 %v904_v10, %v356_v9 }
 0x347   :  { %v386_v12 = vmax.f32 %v357_v11, 0.0 }
 0x349   :  { %456 = vmatmul.f32.gmra.mxu0 %v386_v12 }
 0x34c   :  { %v359_v17 = vpop.f32.mrf.mxu3 }
 0x34d   :  { %v360_v18 = vadd.f32 %v904_v10, %v359_v17 }
 0x34f   :  { %v387_v19 = vmax.f32 %v360_v18, 0.0 }
 0x351   :  { %459 = vmatmul.f32.gmra.mxu0 %v387_v19 }
 0x354   :  { %v362_v20 = vpop.f32.mrf.mxu3 }
 0x355   :  { %v363_v21 = vadd.f32 %v904_v10, %v362_v20 }
 0x357   :  { %v388_v22 = vmax.f32 %v363_v21, 0.0 }
 0x359   :  { %462 = vmatmul.f32.gmra.mxu0 %v388_v22 }
 0x35c   :  { %v365_v23 = vpop.f32.mrf.mxu3 }
 0x35d   :  { %v366_v24 = vadd.f32 %v904_v10, %v365_v23 }
 0x35f   :  { %v389_v25 = vmax.f32 %v366_v24, 0.0 }
 0x361   :  { %465 = vmatmul.f32.gmra.mxu0 %v389_v25 }
 0x364   :  { %v368_v26 = vpop.f32.mrf.mxu3 }
 0x365   :  { %v369_v27 = vadd.f32 %v904_v10, %v368_v26 }
 0x367   :  { %v390_v28 = vmax.f32 %v369_v27, 0.0 }
 0x369   :  { %468 = vmatmul.f32.gmra.mxu0 %v390_v28 }
 0x36c   :  { %v371_v29 = vpop.f32.mrf.mxu3 }
 0x36d   :  { %v372_v30 = vadd.f32 %v904_v10, %v371_v29 }
 0x36f   :  { %v391_v31 = vmax.f32 %v372_v30, 0.0 }
 0x371   :  { %471 = vmatmul.f32.gmra.mxu0 %v391_v31 }
 0x374   :  { %v374_v32 = vpop.f32.mrf.mxu3 }
 0x375   :  { %v375_v33 = vadd.f32 %v904_v10, %v374_v32 }
 0x377   :  { %v392_v48 = vmax.f32 %v375_v33, 0.0 }
 0x379   :  { %474 = vmatmul.f32.gmra.mxu0 %v392_v48 }
 0x37e   :  { %v430_v50 = vpop.f32.mrf.mxu0 }
 0x37f   :  { %v431_v51 = vadd.f32 %v548_v49, %v430_v50 }
 0x381   :  { %478 = vst [vmem:[%s981_s8] sm:$0xff] %v431_v51 }
 0x386   :  { %v433_v52 = vpop.f32.mrf.mxu0 }
 0x387   :  { %v434_v53 = vadd.f32 %v548_v49, %v433_v52 }
 0x389   :  { %479 = vst [vmem:[%s981_s8 + $0x8] sm:$0xff] %v434_v53 }
 0x38e   :  { %v436_v54 = vpop.f32.mrf.mxu0 }
 0x38f   :  { %v437_v55 = vadd.f32 %v548_v49, %v436_v54 }
 0x391   :  { %480 = vst [vmem:[%s981_s8 + $0x10] sm:$0xff] %v437_v55 }
 0x396   :  { %v439_v56 = vpop.f32.mrf.mxu0 }
 0x397   :  { %v440_v60 = vadd.f32 %v548_v49, %v439_v56 }
 0x399   :  { %481 = vst [vmem:[%s981_s8 + $0x18] sm:$0xff] %v440_v60 }
 0x39e   :  { %v442_v1 = vpop.f32.mrf.mxu0 }
 0x39f   :  { %v443_v16 = vadd.f32 %v548_v49, %v442_v1 }
 0x3a1   :  { %482 = vst [vmem:[%s981_s8 + $0x20] sm:$0xff] %v443_v16 }
 0x3a6   :  { %v445_v6 = vpop.f32.mrf.mxu0 }
 0x3a7   :  { %v446_v34 = vadd.f32 %v548_v49, %v445_v6 }
 0x3a9   :  { %483 = vst [vmem:[%s981_s8 + $0x28] sm:$0xff] %v446_v34 }
 0x3ae   :  { %v448_v35 = vpop.f32.mrf.mxu0 }
 0x3af   :  { %v449_v36 = vadd.f32 %v548_v49, %v448_v35 }
 0x3b1   :  { %484 = vst [vmem:[%s981_s8 + $0x30] sm:$0xff] %v449_v36 }
 0x3b6   :  { %v451_v10 = vpop.f32.mrf.mxu0 }
 0x3b7   :  { %v452_v37 = vadd.f32 %v548_v49, %v451_v10 }
 0x3b9   :  { %485 = vst [vmem:[%s981_s8 + $0x38] sm:$0xff] %v452_v37 }
 0x3be   :  { %v454_v38 = vpop.f32.mrf.mxu0 }
 0x3bf   :  { %v455_v39 = vadd.f32 %v548_v49, %v454_v38 }
 0x3c1   :  { %486 = vst [vmem:[%s981_s8 + $0x40] sm:$0xff] %v455_v39 }
 0x3c6   :  { %v457_v40 = vpop.f32.mrf.mxu0 }
 0x3c7   :  { %v458_v41 = vadd.f32 %v548_v49, %v457_v40 }
 0x3c9   :  { %487 = vst [vmem:[%s981_s8 + $0x48] sm:$0xff] %v458_v41 }
 0x3ce   :  { %v460_v42 = vpop.f32.mrf.mxu0 }
 0x3cf   :  { %v461_v13 = vadd.f32 %v548_v49, %v460_v42 }
 0x3d1   :  { %488 = vst [vmem:[%s981_s8 + $0x50] sm:$0xff] %v461_v13 }
 0x3d6   :  { %v463_v14 = vpop.f32.mrf.mxu0 }
 0x3d7   :  { %v464_v43 = vadd.f32 %v548_v49, %v463_v14 }
 0x3d9   :  { %489 = vst [vmem:[%s981_s8 + $0x58] sm:$0xff] %v464_v43 }
 0x3de   :  { %v466_v15 = vpop.f32.mrf.mxu0 }
 0x3df   :  { %v467_v44 = vadd.f32 %v548_v49, %v466_v15 }
 0x3e1   :  { %490 = vst [vmem:[%s981_s8 + $0x60] sm:$0xff] %v467_v44 }
 0x3e6   :  { %v469_v45 = vpop.f32.mrf.mxu0 }
 0x3e7   :  { %v470_v46 = vadd.f32 %v548_v49, %v469_v45 }
 0x3e9   :  { %491 = vst [vmem:[%s981_s8 + $0x68] sm:$0xff] %v470_v46 }
 0x3ee   :  { %v472_v47 = vpop.f32.mrf.mxu0 }
 0x3ef   :  { %v473_v57 = vadd.f32 %v548_v49, %v472_v47 }
 0x3f1   :  { %492 = vst [vmem:[%s981_s8 + $0x70] sm:$0xff] %v473_v57 }
 0x3f6   :  { %v475_v58 = vpop.f32.mrf.mxu0 }
 0x3f7   :  { %v476_v59 = vadd.f32 %v548_v49, %v475_v58 }
 0x3f9   :  { %493 = vst [vmem:[%s981_s8 + $0x78] sm:$0xff] %v476_v59 }

</bundles_post_ra>
